<compile_context>
chip_gen: v6e
topology: v6e:2x2x1
jax: 0.10.0
libtpu: 0.0.40
codegen_flags: <defaults>
</compile_context>

<pallas_src>
import math

import jax
import jax.numpy as jnp
from jax.experimental import pallas as pl
from jax.experimental.pallas import tpu as pltpu

# ----------------------------- configuration -----------------------------
NUM_HEADS    = 4          # attention_config.num_heads
DIM_IN       = 32         # model_config.dim_in
DIM_OUT      = 32         # model_config.dim_out (must equal dim_in for the global path)
LABEL_HIDDEN = 32         # model_config.label_hidden
NUM_CLASSES  = 3
LOCAL_MEM    = 8          # memory_config.local_mem_size
NUM_GLOBAL   = 4          # memory_config.num_global_memory (per class)
F_IN         = 48         # raw input feature width for the synthetic encoder
B            = 2          # real batch size
B_PAD        = 8          # sublane-padded batch
X_PAD        = 64         # lane-padded input feature width

D1 = DIM_IN + LABEL_HIDDEN          # feature dim of c1 / queue / global memory rows (64)
D  = DIM_OUT + LABEL_HIDDEN         # attention output dim (== D1 since dim_in == dim_out)
DH = D // NUM_HEADS                 # per-head dim (16)
G  = NUM_GLOBAL * NUM_CLASSES       # number of global memory rows (12)
FC_PAD = 128                        # lane-padded classifier width

HM = NUM_HEADS * LOCAL_MEM          # 32 block-diag columns for the queue keys
HB = NUM_HEADS * B_PAD              # 32 block-diag columns for the c1 keys (ABD)
HG = NUM_HEADS * G                  # 48 block-diag columns for the global keys

# ---- w64 lane offsets (contraction dim 64 = D); all starts multiples of 128 ----
W_ENC      = 0            # [64, 64]   encoder weight (rows >= F_IN, cols >= DIM_IN zero)
W_LR_QKV   = 128          # [64, 192]  local-read fused Q|K|V over h1 (pad-emb folded to bias)
W_LR_O     = 384          # [64, 64]
W_ABD_QKV  = 512          # [64, 192]
W_ABD_O    = 768          # [64, 64]
W_FC       = 896          # [64, 128]  classifier (lane-padded)
W_KBD_L    = 1024         # [64, HM]   queue keys, block-diag per head, 1/sqrt(D) folded
W_KBD_G    = 1152         # [64, HG]   global keys, block-diag per head, 1/sqrt(D) folded
W_HEADBLK  = 1280         # [64, 64]   per-head all-ones block (self-score expander), scaled
W_TOTAL    = 1408

# ---- bias lane offsets (pre-broadcast to B_PAD rows); starts multiples of 128 ----
BO_ENC      = 0           # 64
BO_LR_QKV   = 128         # 192  (pad-label-embedding contribution folded in)
BO_LR_O     = 384         # 64
BO_ABD_QKV  = 512         # 192
BO_ABD_O    = 768         # 64
BO_FC       = 896         # 128
BO_KEYMASK  = 1024        # HB   additive -1e30 mask on padded-batch key columns (ABD)
BO_TOTAL    = 1152

# ---- aux array (row dim = max of HM / HB / HG, lane starts multiples of 128) ----
AUX_ROWS    = max(HM, HB, HG)   # 48
A_SUMEXP_L  = 0           # [HM, 64]  per-head sum expander for queue scores
A_VBD_L     = 128         # [HM, 64]  block-diag V of queue
A_MASK_C    = 256         # [HB, 64]  head mask for in-kernel c1 K/V rep (also sum expander)
A_SUMEXP_G  = 384         # [HG, 64]  per-head sum expander for global scores
A_VBD_G     = 512         # [HG, 64]  block-diag V of global memories
A_TOTAL     = 640


# ------------------------------- the kernel -------------------------------
def hma_kernel(x_ref, w_ref, aux_ref, b_ref, out_ref):
    f32 = jnp.float32
    mm = lambda a, w: jax.lax.dot_general(
        a, w, (((1,), (0,)), ((), ())), preferred_element_type=f32)
    mm_t = lambda a, b: jax.lax.dot_general(          # a @ b^T
        a, b, (((1,), (1,)), ((), ())), preferred_element_type=f32)

    scale = 1.0 / math.sqrt(float(D))

    # --- encoder.forward_rep(x): relu(x @ W_enc + b_enc) (lane-padded to 64) ---
    h1 = jnp.maximum(mm(x_ref[...], w_ref[:, W_ENC:W_ENC + D])
                     + b_ref[:, BO_ENC:BO_ENC + D], 0.0)                     # [Bp, 64]

    # --- local memory read block: per row, KV = [own c1 row ; queue] ---
    # c1 = cat([h1, pad_emb]); the constant pad-embedding half is folded into the bias.
    qkv1 = mm(h1, w_ref[:, W_LR_QKV:W_LR_QKV + 3 * D]) \
        + b_ref[:, BO_LR_QKV:BO_LR_QKV + 3 * D]                              # [Bp, 3D]
    q1 = qkv1[:, 0:D]
    k1 = qkv1[:, D:2 * D]
    v1 = qkv1[:, 2 * D:3 * D]

    # per-head scores vs the queue (block-diagonal K, scale pre-folded)   [Bp, HM]
    s_q = mm(q1, w_ref[:, W_KBD_L:W_KBD_L + HM])
    # per-head self score, broadcast across each head's 16 lanes          [Bp, D]
    s_self = mm(q1 * k1, w_ref[:, W_HEADBLK:W_HEADBLK + D])
    # one row-wide max is a valid softmax shift for every head
    m1 = jnp.maximum(jnp.max(s_q, axis=-1, keepdims=True),
                     jnp.max(s_self, axis=-1, keepdims=True))
    p_q = jnp.exp(s_q - m1)                                                  # [Bp, HM]
    p_self = jnp.exp(s_self - m1)                                            # [Bp, D]
    denom1 = mm(p_q, aux_ref[0:HM, A_SUMEXP_L:A_SUMEXP_L + D]) + p_self      # [Bp, D]
    av1 = mm(p_q, aux_ref[0:HM, A_VBD_L:A_VBD_L + D]) + p_self * v1          # [Bp, D]
    o1 = q1 + av1 * pl.reciprocal(denom1, approx=True)                       # MAB residual
    c1 = o1 + jnp.maximum(mm(o1, w_ref[:, W_LR_O:W_LR_O + D])
                          + b_ref[:, BO_LR_O:BO_LR_O + D], 0.0)              # [Bp, D]

    # --- ABD block: Q = c1, KV = [c1 (padded rows masked) ; global memories] ---
    qkv2 = mm(c1, w_ref[:, W_ABD_QKV:W_ABD_QKV + 3 * D]) \
        + b_ref[:, BO_ABD_QKV:BO_ABD_QKV + 3 * D]                            # [Bp, 3D]
    q2 = qkv2[:, 0:D]
    k2 = qkv2[:, D:2 * D]
    v2 = qkv2[:, 2 * D:3 * D]

    mask_c = aux_ref[0:HB, A_MASK_C:A_MASK_C + D]                            # [HB, D]
    k2_bd = jnp.concatenate([k2] * NUM_HEADS, axis=0) * mask_c               # [HB, D]
    v2_bd = jnp.concatenate([v2] * NUM_HEADS, axis=0) * mask_c               # [HB, D]
    # scores vs the batch keys (padded key columns get -1e30)              [Bp, HB]
    s_c = mm_t(q2, k2_bd) * scale + b_ref[:, BO_KEYMASK:BO_KEYMASK + HB]
    # scores vs the global memories (block-diagonal K, scale folded)       [Bp, HG]
    s_g = mm(q2, w_ref[:, W_KBD_G:W_KBD_G + HG])
    m2 = jnp.maximum(jnp.max(s_c, axis=-1, keepdims=True),
                     jnp.max(s_g, axis=-1, keepdims=True))
    p_c = jnp.exp(s_c - m2)
    p_g = jnp.exp(s_g - m2)
    denom2 = mm(p_c, mask_c) + mm(p_g, aux_ref[0:HG, A_SUMEXP_G:A_SUMEXP_G + D])
    av2 = mm(p_c, v2_bd) + mm(p_g, aux_ref[0:HG, A_VBD_G:A_VBD_G + D])
    o2 = q2 + av2 * pl.reciprocal(denom2, approx=True)
    c2 = o2 + jnp.maximum(mm(o2, w_ref[:, W_ABD_O:W_ABD_O + D])
                          + b_ref[:, BO_ABD_O:BO_ABD_O + D], 0.0)            # [Bp, D]

    # --- classifier (logits_resource == 'cat'); lane-padded to 128, full-tile store ---
    out_ref[...] = mm(c2, w_ref[:, W_FC:W_FC + FC_PAD]) + b_ref[:, BO_FC:BO_FC + FC_PAD]


# --------------------- one-time parameter packing (wrapper) ----------------
def _head_mask_rows(n):
    """[H*n, D] 0/1: row h*n + j has ones in head h's 16-lane block."""
    r = jnp.arange(NUM_HEADS * n) // n
    d = jnp.arange(D) // DH
    return (r[:, None] == d[None, :]).astype(jnp.float32)


def _block_diag_cols(k_rows):
    """[n, D] per-key K projection -> [D, H*n] block-diagonal per-head key matrix."""
    n = k_rows.shape[0]
    return (jnp.tile(k_rows, (NUM_HEADS, 1)) * _head_mask_rows(n)).T


def _block_diag_rows(v_rows):
    """[n, D] per-key V projection -> [H*n, D] block-diagonal per-head value matrix."""
    n = v_rows.shape[0]
    return jnp.tile(v_rows, (NUM_HEADS, 1)) * _head_mask_rows(n)


def pack_params(p):
    """Parameter-only preprocessing (independent of x): fuse QKV weights, fold the
    constant pad-label-embedding into biases, hoist static queue/global-memory K/V
    projections into block-diagonal per-head matrices, and pack everything into
    three 128-lane-aligned arrays (w64, aux, bias)."""
    f32 = jnp.float32
    scale = 1.0 / math.sqrt(float(D))

    # encoder (input lanes padded F_IN->X_PAD, output lanes padded DIM_IN->D)
    enc_w = jnp.zeros((X_PAD, D), f32).at[:F_IN, :DIM_IN].set(p['enc_w'])
    enc_b = jnp.zeros((1, D), f32).at[:, :DIM_IN].set(p['enc_b'])

    # fused local-read Q|K|V over c1 = [h1 | pad_emb]; pad-emb folded into the bias
    lr_wqkv = jnp.concatenate([p['lr_wq'], p['lr_wk'], p['lr_wv']], axis=1)      # [D1, 3D]
    lr_bqkv = jnp.concatenate([p['lr_bq'], p['lr_bk'], p['lr_bv']], axis=1)      # [1, 3D]
    lr_w_c1 = jnp.zeros((D, 3 * D), f32).at[:DIM_IN, :].set(lr_wqkv[:DIM_IN, :])
    lr_b_c1 = p['pad_emb'] @ lr_wqkv[DIM_IN:, :] + lr_bqkv

    # static queue K/V projections -> block-diagonal per-head layout (scale folded into K)
    kq = p['queue'] @ p['lr_wk'] + p['lr_bk']                                    # [M, D]
    vq = p['queue'] @ p['lr_wv'] + p['lr_bv']
    kbd_l = _block_diag_cols(kq) * scale                                         # [D, HM]
    vbd_l = _block_diag_rows(vq)                                                 # [HM, D]

    abd_wqkv = jnp.concatenate([p['abd_wq'], p['abd_wk'], p['abd_wv']], axis=1)  # [D, 3D]
    abd_bqkv = jnp.concatenate([p['abd_bq'], p['abd_bk'], p['abd_bv']], axis=1)  # [1, 3D]

    # static global-memory K/V projections -> block-diagonal per-head layout
    kg = p['glob'] @ p['abd_wk'] + p['abd_bk']                                   # [G, D]
    vg = p['glob'] @ p['abd_wv'] + p['abd_bv']
    kbd_g = _block_diag_cols(kg) * scale                                         # [D, HG]
    vbd_g = _block_diag_rows(vg)                                                 # [HG, D]

    # per-head all-ones [D, D] block (self-score expander), scale folded
    hd = jnp.arange(D) // DH
    headblk = (hd[:, None] == hd[None, :]).astype(f32) * scale

    fc_w = jnp.zeros((D, FC_PAD), f32).at[:, :NUM_CLASSES].set(p['fc_w'])
    fc_b = jnp.zeros((1, FC_PAD), f32).at[:, :NUM_CLASSES].set(p['fc_b'])

    w64 = jnp.zeros((D, W_TOTAL), f32)
    w64 = w64.at[:, W_ENC:W_ENC + D].set(enc_w)
    w64 = w64.at[:, W_LR_QKV:W_LR_QKV + 3 * D].set(lr_w_c1)
    w64 = w64.at[:, W_LR_O:W_LR_O + D].set(p['lr_wo'])
    w64 = w64.at[:, W_ABD_QKV:W_ABD_QKV + 3 * D].set(abd_wqkv)
    w64 = w64.at[:, W_ABD_O:W_ABD_O + D].set(p['abd_wo'])
    w64 = w64.at[:, W_FC:W_FC + FC_PAD].set(fc_w)
    w64 = w64.at[:, W_KBD_L:W_KBD_L + HM].set(kbd_l)
    w64 = w64.at[:, W_KBD_G:W_KBD_G + HG].set(kbd_g)
    w64 = w64.at[:, W_HEADBLK:W_HEADBLK + D].set(headblk)

    aux = jnp.zeros((AUX_ROWS, A_TOTAL), f32)
    aux = aux.at[:HM, A_SUMEXP_L:A_SUMEXP_L + D].set(_head_mask_rows(LOCAL_MEM))
    aux = aux.at[:HM, A_VBD_L:A_VBD_L + D].set(vbd_l)
    aux = aux.at[:HB, A_MASK_C:A_MASK_C + D].set(_head_mask_rows(B_PAD))
    aux = aux.at[:HG, A_SUMEXP_G:A_SUMEXP_G + D].set(_head_mask_rows(G))
    aux = aux.at[:HG, A_VBD_G:A_VBD_G + D].set(vbd_g)

    # additive key mask: padded batch rows (j >= B) must not be attended to in the ABD block
    keymask = jnp.where(jnp.arange(HB) % B_PAD < B, 0.0, -1e30).astype(f32)[None, :]

    bias1 = jnp.zeros((1, BO_TOTAL), f32)
    bias1 = bias1.at[:, BO_ENC:BO_ENC + D].set(enc_b)
    bias1 = bias1.at[:, BO_LR_QKV:BO_LR_QKV + 3 * D].set(lr_b_c1)
    bias1 = bias1.at[:, BO_LR_O:BO_LR_O + D].set(p['lr_bo'])
    bias1 = bias1.at[:, BO_ABD_QKV:BO_ABD_QKV + 3 * D].set(abd_bqkv)
    bias1 = bias1.at[:, BO_ABD_O:BO_ABD_O + D].set(p['abd_bo'])
    bias1 = bias1.at[:, BO_FC:BO_FC + FC_PAD].set(fc_b)
    bias1 = bias1.at[:, BO_KEYMASK:BO_KEYMASK + HB].set(keymask)
    bias = jnp.tile(bias1, (B_PAD, 1))                 # pre-broadcast to the padded batch

    return dict(w64=w64, aux=aux, bias=bias)


# ------------------------------- the wrapper -------------------------------
@jax.jit
def hma_forward(x, packed):
    # NOTE: the packed additive key mask assumes x.shape[0] == B real rows.
    n = x.shape[0]
    x_pad = jnp.zeros((B_PAD, X_PAD), jnp.float32).at[:n, :F_IN].set(x)
    vmem = pl.BlockSpec(memory_space=pltpu.MemorySpace.VMEM)   # whole arrays resident in VMEM
    logits_pad = pl.pallas_call(
        hma_kernel,
        out_shape=jax.ShapeDtypeStruct((B_PAD, FC_PAD), jnp.float32),
        in_specs=[vmem] * 4,
        out_specs=vmem,
    )(x_pad, packed['w64'], packed['aux'], packed['bias'])
    return logits_pad[:n, :NUM_CLASSES]


# ------------------------- deterministic param init ------------------------
def init_params(key):
    ks = jax.random.split(key, 16)

    def lin(k, fan_in, fan_out):
        kw, kb = jax.random.split(k)
        bound = 1.0 / math.sqrt(fan_in)
        w = jax.random.uniform(kw, (fan_in, fan_out), jnp.float32, -bound, bound)
        b = jax.random.uniform(kb, (1, fan_out), jnp.float32, -bound, bound)
        return w, b

    p = {}
    # synthetic encoder (Linear + ReLU standing in for encoder.forward_rep)
    p['enc_w'], p['enc_b'] = lin(ks[0], F_IN, DIM_IN)

    # label embedding table: num_classes + 1 rows; padding index == NUM_CLASSES
    emb = jax.random.normal(ks[1], (NUM_CLASSES + 1, LABEL_HIDDEN), jnp.float32)
    pad_idx = NUM_CLASSES
    p['pad_emb'] = emb[pad_idx:pad_idx + 1, :]                 # [1, label_hidden]

    # local memory queue: randn, L2-normalized along dim=1 (as in __init__)
    q = jax.random.normal(ks[2], (LOCAL_MEM, D1), jnp.float32)
    p['queue'] = q / jnp.linalg.norm(q, axis=1, keepdims=True)

    # local_read_block: MHSA(D1, D1, D)
    p['lr_wq'], p['lr_bq'] = lin(ks[3], D1, D)
    p['lr_wk'], p['lr_bk'] = lin(ks[4], D1, D)
    p['lr_wv'], p['lr_bv'] = lin(ks[5], D1, D)
    p['lr_wo'], p['lr_bo'] = lin(ks[6], D, D)

    # ABD_block: MHSA(D, D1, D)
    p['abd_wq'], p['abd_bq'] = lin(ks[7], D, D)
    p['abd_wk'], p['abd_bk'] = lin(ks[8], D1, D)
    p['abd_wv'], p['abd_bv'] = lin(ks[9], D1, D)
    p['abd_wo'], p['abd_bo'] = lin(ks[10], D, D)

    # global memories init to zeros (module init); labels = repeat_interleave(arange(C), NUM_GLOBAL)
    glob_mem = jnp.zeros((G, DIM_IN), jnp.float32)
    glob_labels = jnp.repeat(jnp.arange(NUM_CLASSES), NUM_GLOBAL)
    glob_lab_emb = emb[glob_labels, :]                         # embedding lookup
    p['glob'] = jnp.concatenate([glob_mem, glob_lab_emb], axis=1)   # [G, D1]

    # final classifier over dim_out + label_hidden
    p['fc_w'], p['fc_b'] = lin(ks[11], D, NUM_CLASSES)
    return p


# --------------------------- pure-JAX reference ----------------------------
# Faithful, unfused math (per-row local-memory attention, per-head MAB, exact division).
def _mab(Q, KV, wq, bq, wk, bk, wv, bv, wo, bo, num_heads):
    dv = wq.shape[1]
    dh = dv // num_heads
    Qp = Q @ wq + bq
    Kp = KV @ wk + bk
    Vp = KV @ wv + bv
    scale = 1.0 / math.sqrt(float(dv))
    heads = []
    for h in range(num_heads):
        qh = Qp[:, h * dh:(h + 1) * dh]
        kh = Kp[:, h * dh:(h + 1) * dh]
        vh = Vp[:, h * dh:(h + 1) * dh]
        s = (qh @ kh.T) * scale
        s = s - jnp.max(s, axis=-1, keepdims=True)
        p = jnp.exp(s)
        a = p / jnp.sum(p, axis=-1, keepdims=True)
        heads.append(qh + a @ vh)
    O = jnp.concatenate(heads, axis=1)
    return O + jnp.maximum(O @ wo + bo, 0.0)


def reference_forward(x, p):
    h1 = jnp.maximum(x @ p['enc_w'] + p['enc_b'], 0.0)
    e = jnp.broadcast_to(p['pad_emb'], (x.shape[0], LABEL_HIDDEN))
    c1 = jnp.concatenate([h1, e], axis=1)
    rows = []
    for b in range(x.shape[0]):
        qb = c1[b:b + 1]
        kvb = jnp.concatenate([qb, p['queue']], axis=0)
        rows.append(_mab(qb, kvb, p['lr_wq'], p['lr_bq'], p['lr_wk'], p['lr_bk'],
                         p['lr_wv'], p['lr_bv'], p['lr_wo'], p['lr_bo'], NUM_HEADS))
    c1 = jnp.concatenate(rows, axis=0)
    kv = jnp.concatenate([c1, p['glob']], axis=0)
    c1 = _mab(c1, kv, p['abd_wq'], p['abd_bq'], p['abd_wk'], p['abd_bk'],
              p['abd_wv'], p['abd_bv'], p['abd_wo'], p['abd_bo'], NUM_HEADS)
    return c1 @ p['fc_w'] + p['fc_b']


if __name__ == "__main__":
    key = jax.random.PRNGKey(0)
    kx, kp = jax.random.split(key)
    x = jax.random.normal(kx, (B, F_IN), jnp.float32)
    params = init_params(kp)
    packed = pack_params(params)          # one-time parameter preprocessing

    logits = hma_forward(x, packed)
    jax.block_until_ready(logits)

    ref = reference_forward(x, params)
    assert logits.shape == (B, NUM_CLASSES)
    # approx-reciprocal softmax normalization => slightly looser tolerance
    assert jnp.allclose(logits, ref, rtol=1e-2, atol=1e-2), "Pallas kernel mismatch vs reference"
    print("KERNEL_OK")
</pallas_src>

<mosaic_0001>
module attributes {stable_mosaic.version = 11 : i64} {
  func.func @hma_kernel(%arg0: memref<8x64xf32, #tpu.memory_space<vmem>>, %arg1: memref<64x1408xf32, #tpu.memory_space<vmem>>, %arg2: memref<48x640xf32, #tpu.memory_space<vmem>>, %arg3: memref<8x1152xf32, #tpu.memory_space<vmem>>, %arg4: memref<8x128xf32, #tpu.memory_space<vmem>>) attributes {dimension_semantics = [], scalar_prefetch = 0 : i64, scratch_operands = 0 : i64, tpu.core_type = #tpu.core_type<tc>} {
    %c0 = arith.constant 0 : index
    %c0_0 = arith.constant 0 : index
    %0 = vector.load %arg0[%c0, %c0_0] : memref<8x64xf32, #tpu.memory_space<vmem>>, vector<8x64xf32>
    %c0_1 = arith.constant 0 : index
    %c0_2 = arith.constant 0 : index
    %1 = vector.load %arg1[%c0_1, %c0_2] : memref<64x1408xf32, #tpu.memory_space<vmem>>, vector<64x64xf32>
    %cst = arith.constant dense<0.000000e+00> : vector<8x64xf32>
    %2 = tpu.matmul %0, %1, %cst {dimension_numbers = #tpu.dot_dimension_numbers<[1], [0], [0], [1], [0, 0, 1, 1], [], []>} : vector<8x64xf32>, vector<64x64xf32>, vector<8x64xf32> -> vector<8x64xf32>
    %c0_3 = arith.constant 0 : index
    %c0_4 = arith.constant 0 : index
    %3 = vector.load %arg3[%c0_3, %c0_4] : memref<8x1152xf32, #tpu.memory_space<vmem>>, vector<8x64xf32>
    %4 = arith.addf %2, %3 : vector<8x64xf32>
    %cst_5 = arith.constant 0.000000e+00 : f32
    %5 = vector.broadcast %cst_5 : f32 to vector<8x64xf32>
    %6 = arith.maximumf %4, %5 : vector<8x64xf32>
    %c0_6 = arith.constant 0 : index
    %c128 = arith.constant 128 : index
    %7 = vector.load %arg1[%c0_6, %c128] : memref<64x1408xf32, #tpu.memory_space<vmem>>, vector<64x192xf32>
    %cst_7 = arith.constant dense<0.000000e+00> : vector<8x192xf32>
    %8 = tpu.matmul %6, %7, %cst_7 {dimension_numbers = #tpu.dot_dimension_numbers<[1], [0], [0], [1], [0, 0, 1, 1], [], []>} : vector<8x64xf32>, vector<64x192xf32>, vector<8x192xf32> -> vector<8x192xf32>
    %c0_8 = arith.constant 0 : index
    %c128_9 = arith.constant 128 : index
    %9 = vector.load %arg3[%c0_8, %c128_9] : memref<8x1152xf32, #tpu.memory_space<vmem>>, vector<8x192xf32>
    %10 = arith.addf %8, %9 : vector<8x192xf32>
    %11 = vector.extract_strided_slice %10 {offsets = [0, 0], sizes = [8, 64], strides = [1, 1]} : vector<8x192xf32> to vector<8x64xf32>
    %12 = vector.extract_strided_slice %10 {offsets = [0, 64], sizes = [8, 64], strides = [1, 1]} : vector<8x192xf32> to vector<8x64xf32>
    %13 = vector.extract_strided_slice %10 {offsets = [0, 128], sizes = [8, 64], strides = [1, 1]} : vector<8x192xf32> to vector<8x64xf32>
    %c0_10 = arith.constant 0 : index
    %c1024 = arith.constant 1024 : index
    %14 = vector.load %arg1[%c0_10, %c1024] : memref<64x1408xf32, #tpu.memory_space<vmem>>, vector<64x32xf32>
    %cst_11 = arith.constant dense<0.000000e+00> : vector<8x32xf32>
    %15 = tpu.matmul %11, %14, %cst_11 {dimension_numbers = #tpu.dot_dimension_numbers<[1], [0], [0], [1], [0, 0, 1, 1], [], []>} : vector<8x64xf32>, vector<64x32xf32>, vector<8x32xf32> -> vector<8x32xf32>
    %16 = arith.mulf %11, %12 : vector<8x64xf32>
    %c0_12 = arith.constant 0 : index
    %c1280 = arith.constant 1280 : index
    %17 = vector.load %arg1[%c0_12, %c1280] : memref<64x1408xf32, #tpu.memory_space<vmem>>, vector<64x64xf32>
    %cst_13 = arith.constant dense<0.000000e+00> : vector<8x64xf32>
    %18 = tpu.matmul %16, %17, %cst_13 {dimension_numbers = #tpu.dot_dimension_numbers<[1], [0], [0], [1], [0, 0, 1, 1], [], []>} : vector<8x64xf32>, vector<64x64xf32>, vector<8x64xf32> -> vector<8x64xf32>
    %cst_14 = arith.constant dense<0xFF800000> : vector<8xf32>
    %19 = vector.multi_reduction <maximumf>, %15, %cst_14 [1] : vector<8x32xf32> to vector<8xf32>
    %20 = vector.shape_cast %19 : vector<8xf32> to vector<8x1xf32>
    %cst_15 = arith.constant dense<0xFF800000> : vector<8xf32>
    %21 = vector.multi_reduction <maximumf>, %18, %cst_15 [1] : vector<8x64xf32> to vector<8xf32>
    %22 = vector.shape_cast %21 : vector<8xf32> to vector<8x1xf32>
    %23 = arith.maximumf %20, %22 : vector<8x1xf32>
    %24 = vector.broadcast %23 : vector<8x1xf32> to vector<8x32xf32>
    %25 = arith.subf %15, %24 : vector<8x32xf32>
    %26 = math.exp %25 : vector<8x32xf32>
    %27 = vector.broadcast %23 : vector<8x1xf32> to vector<8x64xf32>
    %28 = arith.subf %18, %27 : vector<8x64xf32>
    %29 = math.exp %28 : vector<8x64xf32>
    %c0_16 = arith.constant 0 : index
    %c0_17 = arith.constant 0 : index
    %30 = vector.load %arg2[%c0_16, %c0_17] : memref<48x640xf32, #tpu.memory_space<vmem>>, vector<32x64xf32>
    %cst_18 = arith.constant dense<0.000000e+00> : vector<8x64xf32>
    %31 = tpu.matmul %26, %30, %cst_18 {dimension_numbers = #tpu.dot_dimension_numbers<[1], [0], [0], [1], [0, 0, 1, 1], [], []>} : vector<8x32xf32>, vector<32x64xf32>, vector<8x64xf32> -> vector<8x64xf32>
    %32 = arith.addf %31, %29 : vector<8x64xf32>
    %c0_19 = arith.constant 0 : index
    %c128_20 = arith.constant 128 : index
    %33 = vector.load %arg2[%c0_19, %c128_20] : memref<48x640xf32, #tpu.memory_space<vmem>>, vector<32x64xf32>
    %cst_21 = arith.constant dense<0.000000e+00> : vector<8x64xf32>
    %34 = tpu.matmul %26, %33, %cst_21 {dimension_numbers = #tpu.dot_dimension_numbers<[1], [0], [0], [1], [0, 0, 1, 1], [], []>} : vector<8x32xf32>, vector<32x64xf32>, vector<8x64xf32> -> vector<8x64xf32>
    %35 = arith.mulf %29, %13 : vector<8x64xf32>
    %36 = arith.addf %34, %35 : vector<8x64xf32>
    %37 = tpu.reciprocal %32 {approx = true} : vector<8x64xf32> -> vector<8x64xf32>
    %38 = arith.mulf %36, %37 : vector<8x64xf32>
    %39 = arith.addf %11, %38 : vector<8x64xf32>
    %c0_22 = arith.constant 0 : index
    %c384 = arith.constant 384 : index
    %40 = vector.load %arg1[%c0_22, %c384] : memref<64x1408xf32, #tpu.memory_space<vmem>>, vector<64x64xf32>
    %cst_23 = arith.constant dense<0.000000e+00> : vector<8x64xf32>
    %41 = tpu.matmul %39, %40, %cst_23 {dimension_numbers = #tpu.dot_dimension_numbers<[1], [0], [0], [1], [0, 0, 1, 1], [], []>} : vector<8x64xf32>, vector<64x64xf32>, vector<8x64xf32> -> vector<8x64xf32>
    %c0_24 = arith.constant 0 : index
    %c384_25 = arith.constant 384 : index
    %42 = vector.load %arg3[%c0_24, %c384_25] : memref<8x1152xf32, #tpu.memory_space<vmem>>, vector<8x64xf32>
    %43 = arith.addf %41, %42 : vector<8x64xf32>
    %cst_26 = arith.constant 0.000000e+00 : f32
    %44 = vector.broadcast %cst_26 : f32 to vector<8x64xf32>
    %45 = arith.maximumf %43, %44 : vector<8x64xf32>
    %46 = arith.addf %39, %45 : vector<8x64xf32>
    %c0_27 = arith.constant 0 : index
    %c512 = arith.constant 512 : index
    %47 = vector.load %arg1[%c0_27, %c512] : memref<64x1408xf32, #tpu.memory_space<vmem>>, vector<64x192xf32>
    %cst_28 = arith.constant dense<0.000000e+00> : vector<8x192xf32>
    %48 = tpu.matmul %46, %47, %cst_28 {dimension_numbers = #tpu.dot_dimension_numbers<[1], [0], [0], [1], [0, 0, 1, 1], [], []>} : vector<8x64xf32>, vector<64x192xf32>, vector<8x192xf32> -> vector<8x192xf32>
    %c0_29 = arith.constant 0 : index
    %c512_30 = arith.constant 512 : index
    %49 = vector.load %arg3[%c0_29, %c512_30] : memref<8x1152xf32, #tpu.memory_space<vmem>>, vector<8x192xf32>
    %50 = arith.addf %48, %49 : vector<8x192xf32>
    %51 = vector.extract_strided_slice %50 {offsets = [0, 0], sizes = [8, 64], strides = [1, 1]} : vector<8x192xf32> to vector<8x64xf32>
    %52 = vector.extract_strided_slice %50 {offsets = [0, 64], sizes = [8, 64], strides = [1, 1]} : vector<8x192xf32> to vector<8x64xf32>
    %53 = vector.extract_strided_slice %50 {offsets = [0, 128], sizes = [8, 64], strides = [1, 1]} : vector<8x192xf32> to vector<8x64xf32>
    %c0_31 = arith.constant 0 : index
    %c256 = arith.constant 256 : index
    %54 = vector.load %arg2[%c0_31, %c256] : memref<48x640xf32, #tpu.memory_space<vmem>>, vector<32x64xf32>
    %55 = tpu.concatenate %52, %52, %52, %52 in 0 : vector<8x64xf32>, vector<8x64xf32>, vector<8x64xf32>, vector<8x64xf32> -> vector<32x64xf32>
    %56 = arith.mulf %55, %54 : vector<32x64xf32>
    %57 = tpu.concatenate %53, %53, %53, %53 in 0 : vector<8x64xf32>, vector<8x64xf32>, vector<8x64xf32>, vector<8x64xf32> -> vector<32x64xf32>
    %58 = arith.mulf %57, %54 : vector<32x64xf32>
    %cst_32 = arith.constant dense<0.000000e+00> : vector<8x32xf32>
    %59 = tpu.matmul %51, %56, %cst_32 {dimension_numbers = #tpu.dot_dimension_numbers<[1], [1], [0], [0], [0, 0, 1, 0], [], []>} : vector<8x64xf32>, vector<32x64xf32>, vector<8x32xf32> -> vector<8x32xf32>
    %cst_33 = arith.constant 1.250000e-01 : f32
    %60 = vector.broadcast %cst_33 : f32 to vector<8x32xf32>
    %61 = arith.mulf %59, %60 : vector<8x32xf32>
    %c0_34 = arith.constant 0 : index
    %c1024_35 = arith.constant 1024 : index
    %62 = vector.load %arg3[%c0_34, %c1024_35] : memref<8x1152xf32, #tpu.memory_space<vmem>>, vector<8x32xf32>
    %63 = arith.addf %61, %62 : vector<8x32xf32>
    %c0_36 = arith.constant 0 : index
    %c1152 = arith.constant 1152 : index
    %64 = vector.load %arg1[%c0_36, %c1152] : memref<64x1408xf32, #tpu.memory_space<vmem>>, vector<64x48xf32>
    %cst_37 = arith.constant dense<0.000000e+00> : vector<8x48xf32>
    %65 = tpu.matmul %51, %64, %cst_37 {dimension_numbers = #tpu.dot_dimension_numbers<[1], [0], [0], [1], [0, 0, 1, 1], [], []>} : vector<8x64xf32>, vector<64x48xf32>, vector<8x48xf32> -> vector<8x48xf32>
    %cst_38 = arith.constant dense<0xFF800000> : vector<8xf32>
    %66 = vector.multi_reduction <maximumf>, %63, %cst_38 [1] : vector<8x32xf32> to vector<8xf32>
    %67 = vector.shape_cast %66 : vector<8xf32> to vector<8x1xf32>
    %cst_39 = arith.constant dense<0xFF800000> : vector<8xf32>
    %68 = vector.multi_reduction <maximumf>, %65, %cst_39 [1] : vector<8x48xf32> to vector<8xf32>
    %69 = vector.shape_cast %68 : vector<8xf32> to vector<8x1xf32>
    %70 = arith.maximumf %67, %69 : vector<8x1xf32>
    %71 = vector.broadcast %70 : vector<8x1xf32> to vector<8x32xf32>
    %72 = arith.subf %63, %71 : vector<8x32xf32>
    %73 = math.exp %72 : vector<8x32xf32>
    %74 = vector.broadcast %70 : vector<8x1xf32> to vector<8x48xf32>
    %75 = arith.subf %65, %74 : vector<8x48xf32>
    %76 = math.exp %75 : vector<8x48xf32>
    %cst_40 = arith.constant dense<0.000000e+00> : vector<8x64xf32>
    %77 = tpu.matmul %73, %54, %cst_40 {dimension_numbers = #tpu.dot_dimension_numbers<[1], [0], [0], [1], [0, 0, 1, 1], [], []>} : vector<8x32xf32>, vector<32x64xf32>, vector<8x64xf32> -> vector<8x64xf32>
    %c0_41 = arith.constant 0 : index
    %c384_42 = arith.constant 384 : index
    %78 = vector.load %arg2[%c0_41, %c384_42] : memref<48x640xf32, #tpu.memory_space<vmem>>, vector<48x64xf32>
    %cst_43 = arith.constant dense<0.000000e+00> : vector<8x64xf32>
    %79 = tpu.matmul %76, %78, %cst_43 {dimension_numbers = #tpu.dot_dimension_numbers<[1], [0], [0], [1], [0, 0, 1, 1], [], []>} : vector<8x48xf32>, vector<48x64xf32>, vector<8x64xf32> -> vector<8x64xf32>
    %80 = arith.addf %77, %79 : vector<8x64xf32>
    %cst_44 = arith.constant dense<0.000000e+00> : vector<8x64xf32>
    %81 = tpu.matmul %73, %58, %cst_44 {dimension_numbers = #tpu.dot_dimension_numbers<[1], [0], [0], [1], [0, 0, 1, 1], [], []>} : vector<8x32xf32>, vector<32x64xf32>, vector<8x64xf32> -> vector<8x64xf32>
    %c0_45 = arith.constant 0 : index
    %c512_46 = arith.constant 512 : index
    %82 = vector.load %arg2[%c0_45, %c512_46] : memref<48x640xf32, #tpu.memory_space<vmem>>, vector<48x64xf32>
    %cst_47 = arith.constant dense<0.000000e+00> : vector<8x64xf32>
    %83 = tpu.matmul %76, %82, %cst_47 {dimension_numbers = #tpu.dot_dimension_numbers<[1], [0], [0], [1], [0, 0, 1, 1], [], []>} : vector<8x48xf32>, vector<48x64xf32>, vector<8x64xf32> -> vector<8x64xf32>
    %84 = arith.addf %81, %83 : vector<8x64xf32>
    %85 = tpu.reciprocal %80 {approx = true} : vector<8x64xf32> -> vector<8x64xf32>
    %86 = arith.mulf %84, %85 : vector<8x64xf32>
    %87 = arith.addf %51, %86 : vector<8x64xf32>
    %c0_48 = arith.constant 0 : index
    %c768 = arith.constant 768 : index
    %88 = vector.load %arg1[%c0_48, %c768] : memref<64x1408xf32, #tpu.memory_space<vmem>>, vector<64x64xf32>
    %cst_49 = arith.constant dense<0.000000e+00> : vector<8x64xf32>
    %89 = tpu.matmul %87, %88, %cst_49 {dimension_numbers = #tpu.dot_dimension_numbers<[1], [0], [0], [1], [0, 0, 1, 1], [], []>} : vector<8x64xf32>, vector<64x64xf32>, vector<8x64xf32> -> vector<8x64xf32>
    %c0_50 = arith.constant 0 : index
    %c768_51 = arith.constant 768 : index
    %90 = vector.load %arg3[%c0_50, %c768_51] : memref<8x1152xf32, #tpu.memory_space<vmem>>, vector<8x64xf32>
    %91 = arith.addf %89, %90 : vector<8x64xf32>
    %cst_52 = arith.constant 0.000000e+00 : f32
    %92 = vector.broadcast %cst_52 : f32 to vector<8x64xf32>
    %93 = arith.maximumf %91, %92 : vector<8x64xf32>
    %94 = arith.addf %87, %93 : vector<8x64xf32>
    %c0_53 = arith.constant 0 : index
    %c896 = arith.constant 896 : index
    %95 = vector.load %arg1[%c0_53, %c896] : memref<64x1408xf32, #tpu.memory_space<vmem>>, vector<64x128xf32>
    %cst_54 = arith.constant dense<0.000000e+00> : vector<8x128xf32>
    %96 = tpu.matmul %94, %95, %cst_54 {dimension_numbers = #tpu.dot_dimension_numbers<[1], [0], [0], [1], [0, 0, 1, 1], [], []>} : vector<8x64xf32>, vector<64x128xf32>, vector<8x128xf32> -> vector<8x128xf32>
    %c0_55 = arith.constant 0 : index
    %c896_56 = arith.constant 896 : index
    %97 = vector.load %arg3[%c0_55, %c896_56] : memref<8x1152xf32, #tpu.memory_space<vmem>>, vector<8x128xf32>
    %98 = arith.addf %96, %97 : vector<8x128xf32>
    %c0_57 = arith.constant 0 : index
    %c0_58 = arith.constant 0 : index
    %99 = vector.load %arg4[%c0_57, %c0_58] : memref<8x128xf32, #tpu.memory_space<vmem>>, vector<8x128xf32>
    tpu.vector_store %arg4[%c0_57, %c0_58], %98 {strides = array<i32>} : memref<8x128xf32, #tpu.memory_space<vmem>>, vector<8x128xf32>,
    return
  }
}

</mosaic_0001>

<bundles_post_ra>
// kernel: hma_forward.1
= control target key start
LH: loop header
LB: loop body
LE: loop exit
PB: predicated region body
PF: predicated region fallthrough
CT: control target
= control target key end

     0   :  { %9 = vsyncpa [#allocation3], 0  ;;  %s2103_s0 = inlined_call_operand.vmem [shape: f32[8,64], index: 0, kind: input, shape index: {}]   ;;  %s2104_s1 = inlined_call_operand.hbm [shape: f32[64,1408], index: 1, kind: input, shape index: {}]   ;;  %s2105_s2 = inlined_call_operand.hbm [shape: f32[48,640], index: 2, kind: input, shape index: {}]   ;;  %s2106_s3 = inlined_call_operand.hbm [shape: f32[8,1152], index: 3, kind: input, shape index: {}]   ;;  %s2107_s4 = inlined_call_operand.vmem [shape: f32[8,128], index: 4, kind: output, shape index: {}]  }
   0x1   :  { %10 = vsyncpa [#allocation5], 0  ;;  %s1860_s15 = smov [#allocation4]  }
   0x2   :  { %s30_s16 = sshll.u32 %s1860_s15, 4  ;;  %s31_s16 = int_to_ptr.vmem [resolvable:$true] %s30_s16 }
   0x3   :  { %s1804_s17 = scalar_lea.vmem %s31_s16, 3840  ;;  %p1809_p1 = scmp.lt.s32.totalorder %s31_s16, %s31_s16 }
   0x4   :  { %p1805_p0 = scmp.ne.s32.totalorder %s31_s16, %s1804_s17  ;;  %p1810_p2 = scmp.lt.s32.totalorder %s1804_s17, %s1804_s17 }
   0x6   :  { %p1811_p3 = por %p1810_p2, %p1809_p1 }
   0x8   :  { %p1812_p4 = pnand %p1811_p3, %p1805_p0 }
   0xa   :  { %1815 = shalt.err (!%p1812_p4)
}
   0xb   :  { %s1861_s18 = smov 640   ;;  %s1862_s19 = smov 40  }
   0xc   :  { %36 = dma.hbm_to_vmem [thread:$0]  %s2105_s2, 3840, %s31_s16, [#allocation5], %s1861_s18, %s1861_s18, %s1862_s19  }
   0xd   :  { %s1863_s22 = smov [#allocation2]  }
   0xe   :  { %s18_s23 = sshll.u32 %s1863_s22, 4  ;;  %s19_s23 = int_to_ptr.vmem [resolvable:$true] %s18_s23 }
   0xf   :  { %s1824_s24 = scalar_lea.vmem %s19_s23, 11264  ;;  %p1829_p6 = scmp.lt.s32.totalorder %s19_s23, %s19_s23 }
  0x10   :  { %p1825_p5 = scmp.ne.s32.totalorder %s19_s23, %s1824_s24  ;;  %p1830_p7 = scmp.lt.s32.totalorder %s1824_s24, %s1824_s24 }
  0x12   :  { %p1831_p8 = por %p1830_p7, %p1829_p6 }
  0x14   :  { %p1832_p9 = pnand %p1831_p8, %p1825_p5 }
  0x16   :  { %1835 = shalt.err (!%p1832_p9)
}
  0x17   :  { %s1864_s25 = smov 1408   ;;  %s1865_s26 = smov 88  }
  0x18   :  { %24 = dma.hbm_to_vmem [thread:$0]  %s2104_s1, 11264, %s19_s23, [#allocation3], %s1864_s25, %s1864_s25, %s1865_s26  }
  0x19   :  { %s1866_s29 = smov [#allocation6]  }
  0x1a   :  { %s43_s30 = sshll.u32 %s1866_s29, 4  ;;  %s44_s30 = int_to_ptr.vmem [resolvable:$true] %s43_s30 }
  0x1b   :  { %s1844_s2 = scalar_lea.vmem %s44_s30, 1152  ;;  %p1849_p11 = scmp.lt.s32.totalorder %s44_s30, %s44_s30 }
  0x1c   :  { %p1845_p10 = scmp.ne.s32.totalorder %s44_s30, %s1844_s2  ;;  %p1850_p12 = scmp.lt.s32.totalorder %s1844_s2, %s1844_s2 }
  0x1e   :  { %p1851_p13 = por %p1850_p12, %p1849_p11 }
  0x20   :  { %p1852_p0 = pnand %p1851_p13, %p1845_p10 }
  0x22   :  { %1855 = shalt.err (!%p1852_p0)
}
  0x23   :  { %46 = dma.hbm_to_vmem [thread:$0]  %s2106_s3, 1152, %s44_s30, [#allocation5]  }
  0x24   :  { %1856 = dma.done.wait [#allocation3], 11264  }
  0x25   :  { %1857 = vsyncadd [#allocation3], 4294956032 }
  0x26   :  { %1858 = dma.done.wait [#allocation5], 4992  }
  0x27   :  { %1859 = vsyncadd [#allocation5], 4294962304  ;;  %v1867_v0 = vmov 0.0   ;;  %vm1868_vm0 = vmmov 0   ;;  %v64_v1 = vld [vmem:[#allocation2 + $0x268] sm:$0xff]  ;;  %v63_v2 = vld [vmem:[#allocation2 + $0x210] sm:$0xff] }
  0x28   :  { %1556 = vmatprep.subr.mxu0 %v1867_v0  ;;  %1572 = vmatprep.mubr.msk.f32.mxu0 %vm1868_vm0, %v1867_v0  ;;  %v62_v3 = vld [vmem:[#allocation2 + $0x1b8] sm:$0xff]  ;;  %v155_v5 = vld [vmem:[#allocation2 + $0x270] sm:$0xff]  ;;  %v154_v6 = vld [vmem:[#allocation2 + $0x220] sm:$0xff]  ;;  %vm66_vm1 = vcmask 523264   ;;  %vm399_vm2 = vcmask 261120   ;;  %vm949_vm3 = vcmask 392192  }
  0x29   :  { %226 = vmatprep.mubr.f32.mxu1 %v1867_v0  ;;  %1557 = vmatpush3.msra.mxu0 %v64_v1  ;;  %v156_v4 = vld [vmem:[#allocation2 + $0x278] sm:$0xff]  ;;  %v61_v7 = vld [vmem:[#allocation2 + $0x160] sm:$0xff]  ;;  %v152_v9 = vld [vmem:[#allocation2 + $0x1c8] sm:$0xff] }
  0x2a   :  { %1558 = vmatprep.subr.mxu0 %v1867_v0  ;;  %178 = vmatprep.subr.mxu1 %v156_v4  ;;  %v153_v8 = vld [vmem:[#allocation2 + $0x218] sm:$0xff]  ;;  %v60_v10 = vld [vmem:[#allocation2 + $0x108] sm:$0xff]  ;;  %v151_v11 = vld [vmem:[#allocation2 + $0x1c0] sm:$0xff] }
  0x2b   :  { %1559 = vmatpush3.msra.mxu0 %v63_v2  ;;  %179 = vmatpush1.msra.mxu1 %v155_v5  ;;  %v150_v12 = vld [vmem:[#allocation2 + $0x170] sm:$0xff]  ;;  %v149_v14 = vld [vmem:[#allocation2 + $0x168] sm:$0xff]  ;;  %v148_v15 = vld [vmem:[#allocation2 + $0x118] sm:$0xff] }
  0x2c   :  { %1560 = vmatprep.subr.mxu0 %v1867_v0  ;;  %180 = vmatprep.subr.mxu1 %v154_v6  ;;  %v59_v13 = vld [vmem:[#allocation2 + $0xb0] sm:$0xff]  ;;  %v58_v16 = vld [vmem:[#allocation2 + $0x58] sm:$0xff]  ;;  %v146_v18 = vld [vmem:[#allocation2 + $0xc0] sm:$0xff] }
  0x2d   :  { %1561 = vmatpush3.msra.mxu0 %v62_v3  ;;  %181 = vmatpush1.msra.mxu1 %v153_v8  ;;  %v147_v17 = vld [vmem:[#allocation2 + $0x110] sm:$0xff]  ;;  %v57_v19 = vld [vmem:[#allocation2] sm:$0xff]  ;;  %v145_v21 = vld [vmem:[#allocation2 + $0xb8] sm:$0xff] }
  0x2e   :  { %1562 = vmatprep.subr.mxu0 %v1867_v0  ;;  %182 = vmatprep.subr.mxu1 %v152_v9  ;;  %v56_v20 = vld [vmem:[%s2103_s0] sm:$0xff]  ;;  %v144_v22 = vld [vmem:[#allocation2 + $0x68] sm:$0xff]  ;;  %v142_v24 = vld [vmem:[#allocation2 + $0x10] sm:$0xff]  ;;  %s1869_s0 = smov 64  }
  0x2f   :  { %1563 = vmatpush3.msra.mxu0 %v61_v7  ;;  %183 = vmatpush1.msra.mxu1 %v151_v11  ;;  %v143_v23 = vld [vmem:[#allocation2 + $0x60] sm:$0xff]  ;;  %v141_v25 = vld [vmem:[#allocation2 + $0x8] sm:$0xff]  ;;  %v239_v27 = vld [vmem:[#allocation2 + $0x250] sm:$0xff] }
  0x30   :  { %1564 = vmatprep.subr.mxu0 %v1867_v0  ;;  %184 = vmatprep.subr.mxu1 %v150_v12  ;;  %v240_v26 = vld [vmem:[#allocation2 + $0x2a8] sm:$0xff]  ;;  %v238_v28 = vld [vmem:[#allocation2 + $0x1f8] sm:$0xff]  ;;  %v237_v29 = vld [vmem:[#allocation2 + $0x1a0] sm:$0xff] }
  0x31   :  { %1565 = vmatpush3.msra.mxu0 %v60_v10  ;;  %185 = vmatpush1.msra.mxu1 %v149_v14  ;;  %v236_v30 = vld [vmem:[#allocation2 + $0x148] sm:$0xff]  ;;  %v235_v31 = vld [vmem:[#allocation2 + $0xf0] sm:$0xff]  ;;  %v234_v37 = vld [vmem:[#allocation2 + $0x98] sm:$0xff] }
  0x32   :  { %1566 = vmatprep.subr.mxu0 %v1867_v0  ;;  %186 = vmatprep.subr.mxu1 %v148_v15  ;;  %v65_v32 = vld [vmem:[#allocation6] sm:$0xff]  ;;  %v233_v38 = vld [vmem:[#allocation2 + $0x40] sm:$0xff]  ;;  %v325_v39 = vld [vmem:[#allocation2 + $0x2b8] sm:$0xff] }
  0x33   :  { %1567 = vmatpush3.msra.mxu0 %v59_v13  ;;  %187 = vmatpush1.msra.mxu1 %v147_v17  ;;  %v324_v40 = vld [vmem:[#allocation2 + $0x260] sm:$0xff]  ;;  %v323_v41 = vld [vmem:[#allocation2 + $0x208] sm:$0xff]  ;;  %v322_v42 = vld [vmem:[#allocation2 + $0x1b0] sm:$0xff] }
  0x34   :  { %1568 = vmatprep.subr.mxu0 %v1867_v0  ;;  %188 = vmatprep.subr.mxu1 %v146_v18  ;;  %v321_v43 = vld [vmem:[#allocation2 + $0x158] sm:$0xff]  ;;  %v320_v44 = vld [vmem:[#allocation2 + $0x100] sm:$0xff]  ;;  %v319_v45 = vld [vmem:[#allocation2 + $0xa8] sm:$0xff] }
  0x35   :  { %1569 = vmatpush3.msra.mxu0 %v58_v16  ;;  %189 = vmatpush1.msra.mxu1 %v145_v21  ;;  %v318_v46 = vld [vmem:[#allocation2 + $0x50] sm:$0xff]  ;;  %v157_v47 = vld [vmem:[#allocation6 + $0x8] sm:$0xff]  ;;  %v493_v60 = vld [vmem:[#allocation4 + $0x80] sm:$0xff] }
  0x36   :  { %1570 = vmatprep.subr.mxu0 %v1867_v0  ;;  %190 = vmatprep.subr.mxu1 %v144_v22  ;;  %v416_v59 = vld [vmem:[#allocation4 + $0x78] sm:$0xff]  ;;  %v415_v61 = vld [vmem:[#allocation4 + $0x50] sm:$0xff]  ;;  %v414_v63 = vld [vmem:[#allocation4 + $0x28] sm:$0xff] }
  0x37   :  { %1571 = vmatpush3.msra.mxu0 %v57_v19  ;;  %191 = vmatpush1.msra.mxu1 %v143_v23  ;;  %v492_v62 = vld [vmem:[#allocation4 + $0x58] sm:$0xff]  ;;  %v491_v1 = vld [vmem:[#allocation4 + $0x30] sm:$0xff]  ;;  %v413_v2 = vld [vmem:[#allocation4] sm:$0xff] }
  0x38   :  { %1573 = vmatmul.mubr.msk.f32.vlgmr.msra.gmra.mxu0 %vm66_vm1, %v56_v20  ;;  %1575 = vmatprep.subr.mxu0 %v1867_v0  ;;  %v490_v3 = vld [vmem:[#allocation4 + $0x8] sm:$0xff]  ;;  %v575_v10 = vld [vmem:[#allocation2 + $0x280] sm:$0xff]  ;;  %v573_v12 = vld [vmem:[#allocation2 + $0x1d0] sm:$0xff] }
  0x39   :  { %1591 = vmatprep.mubr.msk.f32.mxu0 %vm1868_vm0, %v1867_v0  ;;  %192 = vmatprep.subr.mxu1 %v142_v24  ;;  %v574_v11 = vld [vmem:[#allocation2 + $0x228] sm:$0xff]  ;;  %v572_v13 = vld [vmem:[#allocation2 + $0x178] sm:$0xff]  ;;  %v571_v14 = vld [vmem:[#allocation2 + $0x120] sm:$0xff] }
  0x3a   :  { %193 = vmatpush1.msra.mxu1 %v141_v25  ;;  %1576 = vmatpush3.msra.mxu0 %v240_v26  ;;  %v570_v15 = vld [vmem:[#allocation2 + $0xc8] sm:$0xff]  ;;  %v569_v16 = vld [vmem:[#allocation2 + $0x70] sm:$0xff]  ;;  %v568_v17 = vld [vmem:[#allocation2 + $0x18] sm:$0xff] }
  0x3b   :  { %1594 = vmatprep.subr.mxu1 %v1867_v0  ;;  %1577 = vmatprep.subr.mxu0 %v1867_v0  ;;  %v667_v18 = vld [vmem:[#allocation2 + $0x290] sm:$0xff]  ;;  %v666_v19 = vld [vmem:[#allocation2 + $0x288] sm:$0xff]  ;;  %v665_v20 = vld [vmem:[#allocation2 + $0x238] sm:$0xff] }
  0x3c   :  { %1578 = vmatpush3.msra.mxu0 %v239_v27  ;;  %v664_v21 = vld [vmem:[#allocation2 + $0x230] sm:$0xff]  ;;  %v663_v22 = vld [vmem:[#allocation2 + $0x1e0] sm:$0xff]  ;;  %v662_v23 = vld [vmem:[#allocation2 + $0x1d8] sm:$0xff] }
  0x3d   :  { %1579 = vmatprep.subr.mxu0 %v1867_v0  ;;  %v661_v24 = vld [vmem:[#allocation2 + $0x188] sm:$0xff]  ;;  %v660_v25 = vld [vmem:[#allocation2 + $0x180] sm:$0xff]  ;;  %v659_v26 = vld [vmem:[#allocation2 + $0x130] sm:$0xff] }
  0x3e   :  { %1580 = vmatpush3.msra.mxu0 %v238_v28 }
  0x3f   :  { %1581 = vmatprep.subr.mxu0 %v1867_v0 }
  0x40   :  { %1582 = vmatpush3.msra.mxu0 %v237_v29 }
  0x41   :  { %1583 = vmatprep.subr.mxu0 %v1867_v0 }
  0x42   :  { %1584 = vmatpush3.msra.mxu0 %v236_v30 }
  0x43   :  { %1585 = vmatprep.subr.mxu0 %v1867_v0 }
  0x44   :  { %1586 = vmatpush3.msra.mxu0 %v235_v31 }
  0x45   :  { %1587 = vmatprep.subr.mxu0 %v1867_v0 }
  0x46   :  { %1588 = vmatpush3.msra.mxu0 %v234_v37 }
  0x47   :  { %1589 = vmatprep.subr.mxu0 %v1867_v0 }
  0x48   :  { %1590 = vmatpush3.msra.mxu0 %v233_v38 }
  0x49   :  { %1613 = vmatprep.subr.mxu0 %v1867_v0 }
  0xf8   :  { %v136_v33 = vpop.f32.mrf.mxu0 }
  0xf9   :  { %v137_v34 = vadd.f32 %v136_v33, %v65_v32 }
  0xfa   :  { %v1574_v35 = vpop.f32.mrf.mxu0 }
  0xfb   :  { %v140_v36 = vmax.f32 %v137_v34, 0.0  ;;  %v158_v35 = vld [vmem:[#allocation6 + $0x10] sm:$0xff] }
  0xfd   :  { %1435 = vmatmul.mubr.msk.f32.vlgmr.msra.gmra.mxu1 %vm66_vm1, %v140_v36 }
  0xfe   :  { %1610 = vmatprep.mubr.msk.f32.mxu1 %vm1868_vm0, %v1867_v0  ;;  %1595 = vmatpush3.msra.mxu1 %v325_v39 }
  0xff   :  { %1596 = vmatprep.subr.mxu1 %v1867_v0 }
 0x100   :  { %1597 = vmatpush3.msra.mxu1 %v324_v40 }
 0x101   :  { %1598 = vmatprep.subr.mxu1 %v1867_v0 }
 0x102   :  { %1599 = vmatpush3.msra.mxu1 %v323_v41 }
 0x103   :  { %1600 = vmatprep.subr.mxu1 %v1867_v0 }
 0x104   :  { %1601 = vmatpush3.msra.mxu1 %v322_v42  ;;  %v658_v42 = vld [vmem:[#allocation2 + $0x128] sm:$0xff] }
 0x105   :  { %1602 = vmatprep.subr.mxu1 %v1867_v0 }
 0x106   :  { %1603 = vmatpush3.msra.mxu1 %v321_v43  ;;  %v657_v43 = vld [vmem:[#allocation2 + $0xd8] sm:$0xff] }
 0x107   :  { %1604 = vmatprep.subr.mxu1 %v1867_v0 }
 0x108   :  { %1605 = vmatpush3.msra.mxu1 %v320_v44  ;;  %v656_v44 = vld [vmem:[#allocation2 + $0xd0] sm:$0xff] }
 0x109   :  { %1606 = vmatprep.subr.mxu1 %v1867_v0 }
 0x10a   :  { %1607 = vmatpush3.msra.mxu1 %v319_v45  ;;  %v655_v45 = vld [vmem:[#allocation2 + $0x80] sm:$0xff] }
 0x10b   :  { %1608 = vmatprep.subr.mxu1 %v1867_v0 }
 0x10c   :  { %1609 = vmatpush3.msra.mxu1 %v318_v46  ;;  %v654_v46 = vld [vmem:[#allocation2 + $0x78] sm:$0xff] }
 0x10d   :  { %1624 = vmatprep.subr.mxu1 %v1867_v0 }
 0x1bd   :  { %v228_v48 = vpop.f32.mrf.mxu1 }
 0x1be   :  { %v1942_v49 = vadd.f32 %v228_v48, %v157_v47  ;;  %v653_v47 = vld [vmem:[#allocation2 + $0x28] sm:$0xff]  ;;  %v652_v48 = vld [vmem:[#allocation2 + $0x20] sm:$0xff] }
 0x1bf   :  { %v1955_v55 = vpop.f32.mrf.mxu1 }
 0x1c0   :  { %314 = vrot.lane.b32.xlu0 %v1942_v49, %s1869_s0  ;;  %1592 = vmatmul.mubr.msk.f32.vlgmr.msra.gmra.mxu0 %vm66_vm1, %v1942_v49  ;;  %v231_v36 = vadd.f32 %v1955_v55, %v158_v35 }
 0x1c1   :  { %1621 = vmatprep.mubr.msk.f32.mxu0 %vm1868_vm0, %v1867_v0  ;;  %1614 = vmatpush3.msra.mxu0 %v416_v59  ;;  %v875_v59 = vld [vmem:[#allocation2 + $0x2b0] sm:$0xff] }
 0x1c2   :  { %1615 = vmatprep.subr.mxu0 %v1867_v0 }
 0x1c3   :  { %1616 = vmatpush3.msra.mxu0 %v415_v61  ;;  %v873_v61 = vld [vmem:[#allocation2 + $0x200] sm:$0xff] }
 0x1c4   :  { %1617 = vmatprep.subr.mxu0 %v1867_v0 }
 0x1c5   :  { %1618 = vmatpush3.msra.mxu0 %v414_v63  ;;  %v871_v63 = vld [vmem:[#allocation2 + $0x150] sm:$0xff] }
 0x1c6   :  { %1619 = vmatprep.subr.mxu0 %v1867_v0 }
 0x1c7   :  { %1620 = vmatpush3.msra.mxu0 %v413_v2  ;;  %v869_v2 = vld [vmem:[#allocation2 + $0xa0] sm:$0xff] }
 0x1c8   :  { %1635 = vmatprep.subr.mxu0 %v1867_v0 }
 0x232   :  { %v315_v50 = vpop.permute.xlu0 %314 }
 0x233   :  { %v317_v51 = vmul.f32 %v315_v50, %v1942_v49  ;;  %v1992_v50 = vld [vmem:[#allocation4 + $0x60] sm:$0xff] }
 0x235   :  { %1611 = vmatmul.mubr.msk.f32.vlgmr.msra.gmra.mxu1 %vm66_vm1, %v317_v51  ;;  %v1996_v51 = vld [vmem:[#allocation4 + $0x38] sm:$0xff] }
 0x236   :  { %1632 = vmatprep.mubr.msk.f32.mxu1 %vm1868_vm0, %v1867_v0  ;;  %1625 = vmatpush3.msra.mxu1 %v493_v60  ;;  %v874_v60 = vld [vmem:[#allocation2 + $0x258] sm:$0xff] }
 0x237   :  { %1626 = vmatprep.subr.mxu1 %v1867_v0 }
 0x238   :  { %1627 = vmatpush3.msra.mxu1 %v492_v62  ;;  %v872_v62 = vld [vmem:[#allocation2 + $0x1a8] sm:$0xff] }
 0x239   :  { %1628 = vmatprep.subr.mxu1 %v1867_v0 }
 0x23a   :  { %1629 = vmatpush3.msra.mxu1 %v491_v1  ;;  %v870_v1 = vld [vmem:[#allocation2 + $0xf8] sm:$0xff] }
 0x23b   :  { %1630 = vmatprep.subr.mxu1 %v1867_v0 }
 0x23c   :  { %1631 = vmatpush3.msra.mxu1 %v490_v3  ;;  %v868_v3 = vld [vmem:[#allocation2 + $0x48] sm:$0xff] }
 0x23d   :  { %689 = vmatprep.subr.mxu1 %v667_v18 }
 0x280   :  { %v310_v52 = vpop.f32.mrf.mxu0 }
 0x281   :  { %v400_v53 = vsel %vm399_vm2, %v310_v52, -inf }
 0x282   :  { %401 = vmax.xlane.f32.xlu0 %v400_v53  ;;  %v1593_v54 = vpop.f32.mrf.mxu0  ;;  %v576_v53 = vld [vmem:[#allocation6 + $0x18] sm:$0xff] }
 0x2f5   :  { %v1957_v56 = vpop.f32.mrf.mxu1 }
 0x2f6   :  { %v403_v57 = vsel %vm66_vm1, %v1957_v56, -inf }
 0x2f7   :  { %404 = vmax.xlane.f32.xlu1 %v403_v57  ;;  %v1612_v58 = vpop.f32.mrf.mxu1 }
 0x30b   :  { %v402_v4 = vpop.xlane.xlu0 %401 }
 0x380   :  { %v405_v5 = vpop.xlane.xlu1 %404 }
 0x381   :  { %v406_v6 = vmax.f32 %v402_v4, %v405_v5 }
 0x383   :  { %v407_v7 = vsub.f32 %v310_v52, %v406_v6  ;;  %v410_v27 = vsub.f32 %v1957_v56, %v406_v6  ;;  %v2000_v52 = vld [vmem:[#allocation4 + $0x10] sm:$0xff] }
 0x384   :  { %v668_v6 = vld [vmem:[#allocation6 + $0x20] sm:$0xff] }
 0x385   :  { %v408_v8 = vmul.f32 1.442695, %v407_v7  ;;  %v411_v28 = vmul.f32 1.442695, %v410_v27 }
 0x387   :  { %1784 = vpow2.f32 %v408_v8 }
 0x388   :  { %1786 = vpow2.f32 %v411_v28 }
 0x394   :  { %v1785_v9 = vpop.eup %1784 }
 0x395   :  { %1622 = vmatmul.mubr.msk.f32.vlgmr.msra.gmra.mxu0 %vm399_vm2, %v1785_v9  ;;  %1633 = vmatmul.mubr.msk.f32.vlgmr.msra.gmra.mxu1 %vm399_vm2, %v1785_v9  ;;  %v1787_v29 = vpop.eup %1786 }
 0x396   :  { %1651 = vmatprep.mubr.msk.f32.mxu0 %vm1868_vm0, %v1867_v0  ;;  %737 = vmatprep.mubr.f32.mxu1 %v1867_v0  ;;  %v494_v37 = vmul.f32 %v1787_v29, %v231_v36 }
 0x397   :  { %1636 = vmatpush3.msra.mxu0 %v575_v10  ;;  %690 = vmatpush1.msra.mxu1 %v666_v19 }
 0x398   :  { %1637 = vmatprep.subr.mxu0 %v1867_v0  ;;  %691 = vmatprep.subr.mxu1 %v665_v20 }
 0x399   :  { %1638 = vmatpush3.msra.mxu0 %v574_v11  ;;  %692 = vmatpush1.msra.mxu1 %v664_v21 }
 0x39a   :  { %1639 = vmatprep.subr.mxu0 %v1867_v0  ;;  %693 = vmatprep.subr.mxu1 %v663_v22 }
 0x39b   :  { %1640 = vmatpush3.msra.mxu0 %v573_v12  ;;  %694 = vmatpush1.msra.mxu1 %v662_v23 }
 0x39c   :  { %1641 = vmatprep.subr.mxu0 %v1867_v0  ;;  %695 = vmatprep.subr.mxu1 %v661_v24  ;;  %v866_v24 = vld [vmem:[#allocation6 + $0x40] sm:$0xff] }
 0x39d   :  { %1642 = vmatpush3.msra.mxu0 %v572_v13  ;;  %696 = vmatpush1.msra.mxu1 %v660_v25 }
 0x39e   :  { %1643 = vmatprep.subr.mxu0 %v1867_v0  ;;  %697 = vmatprep.subr.mxu1 %v659_v26 }
 0x39f   :  { %1644 = vmatpush3.msra.mxu0 %v571_v14  ;;  %698 = vmatpush1.msra.mxu1 %v658_v42  ;;  %v669_v42 = vld [vmem:[#allocation6 + $0x28] sm:$0xff] }
 0x3a0   :  { %1645 = vmatprep.subr.mxu0 %v1867_v0  ;;  %699 = vmatprep.subr.mxu1 %v657_v43 }
 0x3a1   :  { %1646 = vmatpush3.msra.mxu0 %v570_v15  ;;  %700 = vmatpush1.msra.mxu1 %v656_v44  ;;  %v1117_v44 = vld [vmem:[#allocation4 + $0xe8] sm:$0xff] }
 0x3a2   :  { %1647 = vmatprep.subr.mxu0 %v1867_v0  ;;  %701 = vmatprep.subr.mxu1 %v655_v45 }
 0x3a3   :  { %1648 = vmatpush3.msra.mxu0 %v569_v16  ;;  %702 = vmatpush1.msra.mxu1 %v654_v46 }
 0x3a4   :  { %1649 = vmatprep.subr.mxu0 %v1867_v0  ;;  %703 = vmatprep.subr.mxu1 %v653_v47 }
 0x3a5   :  { %1650 = vmatpush3.msra.mxu0 %v568_v17  ;;  %704 = vmatpush1.msra.mxu1 %v652_v48  ;;  %v1116_v48 = vld [vmem:[#allocation4 + $0xc0] sm:$0xff] }
 0x3a6   :  { %1654 = vmatprep.subr.mxu0 %v1867_v0  ;;  %1665 = vmatprep.subr.mxu1 %v1867_v0 }
 0x455   :  { %v486_v30 = vpop.f32.mrf.mxu0  ;;  %v561_v31 = vpop.f32.mrf.mxu1 }
 0x456   :  { %v487_v32 = vadd.f32 %v1787_v29, %v486_v30  ;;  %v562_v38 = vadd.f32 %v561_v31, %v494_v37  ;;  %v965_v29 = vld [vmem:[#allocation4 + $0xe0] sm:$0xff]  ;;  %v964_v30 = vld [vmem:[#allocation4 + $0xb8] sm:$0xff]  ;;  %v963_v31 = vld [vmem:[#allocation4 + $0x90] sm:$0xff] }
 0x457   :  { %v1623_v33 = vpop.f32.mrf.mxu0  ;;  %v1634_v34 = vpop.f32.mrf.mxu1 }
 0x458   :  { %1788 = vrcp.f32 %v487_v32  ;;  %v962_v32 = vld [vmem:[#allocation4 + $0x68] sm:$0xff]  ;;  %v961_v33 = vld [vmem:[#allocation4 + $0x40] sm:$0xff]  ;;  %v960_v34 = vld [vmem:[#allocation4 + $0x18] sm:$0xff] }
 0x465   :  { %v1789_v39 = vpop.eup %1788 }
 0x466   :  { %v566_v40 = vmul.f32 %v1789_v39, %v562_v38 }
 0x468   :  { %v567_v41 = vadd.f32 %v566_v40, %v1942_v49  ;;  %v1987_v49 = vld [vmem:[#allocation4 + $0x88] sm:$0xff] }
 0x469   :  { %758 = vrot.lane.b32.xlu1 %v1987_v49, %s1869_s0 }
 0x46a   :  { %1652 = vmatmul.mubr.msk.f32.vlgmr.msra.gmra.mxu0 %vm66_vm1, %v567_v41 }
 0x46b   :  { %1662 = vmatprep.mubr.msk.f32.mxu0 %vm1868_vm0, %v1867_v0 }
 0x46d   :  { %756 = vrot.lane.b32.xlu1 %v1992_v50, %s1869_s0 }
 0x471   :  { %754 = vrot.lane.b32.xlu1 %v1996_v51, %s1869_s0 }
 0x475   :  { %752 = vrot.lane.b32.xlu1 %v2000_v52, %s1869_s0 }
 0x4db   :  { %v759_v4 = vpop.permute.xlu1 %758 }
 0x4df   :  { %v757_v5 = vpop.permute.xlu1 %756 }
 0x4e3   :  { %v755_v9 = vpop.permute.xlu1 %754 }
 0x4e7   :  { %v753_v13 = vpop.permute.xlu1 %752 }
 0x52a   :  { %v646_v54 = vpop.f32.mrf.mxu0 }
 0x52b   :  { %v647_v55 = vadd.f32 %v646_v54, %v576_v53  ;;  %v1115_v54 = vld [vmem:[#allocation4 + $0x98] sm:$0xff] }
 0x52c   :  { %v1653_v56 = vpop.f32.mrf.mxu0 }
 0x52d   :  { %v650_v57 = vmax.f32 %v647_v55, 0.0  ;;  %v1114_v56 = vld [vmem:[#allocation4 + $0x70] sm:$0xff] }
 0x52f   :  { %v651_v58 = vadd.f32 %v650_v57, %v567_v41  ;;  %v1267_v57 = vld [vmem:[#allocation2 + $0x240] sm:$0xff] }
 0x531   :  { %1441 = vmatmul.mubr.msk.f32.vlgmr.msra.gmra.mxu1 %vm66_vm1, %v651_v58  ;;  %v1266_v58 = vld [vmem:[#allocation2 + $0x1e8] sm:$0xff] }
 0x532   :  { %1666 = vmatpush3.msra.mxu1 %v875_v59  ;;  %1681 = vmatprep.mubr.msk.f32.mxu1 %vm1868_vm0, %v1867_v0  ;;  %v1265_v59 = vld [vmem:[#allocation2 + $0x190] sm:$0xff] }
 0x533   :  { %1667 = vmatprep.subr.mxu1 %v1867_v0 }
 0x534   :  { %1668 = vmatpush3.msra.mxu1 %v874_v60  ;;  %v1264_v60 = vld [vmem:[#allocation2 + $0x138] sm:$0xff] }
 0x535   :  { %1669 = vmatprep.subr.mxu1 %v1867_v0 }
 0x536   :  { %1670 = vmatpush3.msra.mxu1 %v873_v61  ;;  %v1263_v61 = vld [vmem:[#allocation2 + $0xe0] sm:$0xff] }
 0x537   :  { %1671 = vmatprep.subr.mxu1 %v1867_v0 }
 0x538   :  { %1672 = vmatpush3.msra.mxu1 %v872_v62  ;;  %v1262_v62 = vld [vmem:[#allocation2 + $0x88] sm:$0xff] }
 0x539   :  { %1673 = vmatprep.subr.mxu1 %v1867_v0 }
 0x53a   :  { %1674 = vmatpush3.msra.mxu1 %v871_v63  ;;  %v1261_v63 = vld [vmem:[#allocation2 + $0x30] sm:$0xff] }
 0x53b   :  { %1675 = vmatprep.subr.mxu1 %v1867_v0 }
 0x53c   :  { %1676 = vmatpush3.msra.mxu1 %v870_v1  ;;  %v1352_v1 = vld [vmem:[#allocation2 + $0x2a0] sm:$0xff] }
 0x53d   :  { %1677 = vmatprep.subr.mxu1 %v1867_v0 }
 0x53e   :  { %1678 = vmatpush3.msra.mxu1 %v869_v2  ;;  %v1351_v2 = vld [vmem:[#allocation2 + $0x248] sm:$0xff] }
 0x53f   :  { %1679 = vmatprep.subr.mxu1 %v1867_v0 }
 0x540   :  { %1680 = vmatpush3.msra.mxu1 %v868_v3  ;;  %v1350_v3 = vld [vmem:[#allocation2 + $0x1f0] sm:$0xff] }
 0x541   :  { %1699 = vmatprep.subr.mxu1 %v1867_v0 }
 0x5f1   :  { %v739_v7 = vpop.f32.mrf.mxu1 }
 0x5f2   :  { %v2015_v8 = vadd.f32 %v739_v7, %v668_v6 }
 0x5f3   :  { %v741_v19 = vpop.f32.mrf.mxu1 }
 0x5f4   :  { %1682 = vmatmul.mubr.msk.f32.vlgmr.msra.gmra.mxu1 %vm66_vm1, %v2015_v8  ;;  %v767_v10 = vmul.f32 %v759_v4, %v2015_v8  ;;  %v766_v11 = vmul.f32 %v757_v5, %v2015_v8  ;;  %v765_v12 = vmul.f32 %v755_v9, %v2015_v8  ;;  %v764_v14 = vmul.f32 %v753_v13, %v2015_v8  ;;  %v1349_v4 = vld [vmem:[#allocation2 + $0x198] sm:$0xff] }
 0x5f5   :  { %1700 = vmatpush3.msra.mxu1 %v1987_v49  ;;  %1707 = vmatprep.mubr.msk.f32.mxu1 %vm1868_vm0, %v1867_v0  ;;  %v742_v43 = vadd.f32 %v741_v19, %v669_v42  ;;  %v1348_v19 = vld [vmem:[#allocation2 + $0x140] sm:$0xff] }
 0x5f6   :  { %782 = vrot.lane.b32.xlu1 %v767_v10, %s1869_s0  ;;  %780 = vrot.lane.b32.xlu0 %v766_v11, %s1869_s0 }
 0x5f7   :  { %1701 = vmatprep.subr.mxu1 %v1867_v0  ;;  %v771_v47 = vmul.f32 %v1987_v49, %v742_v43  ;;  %v770_v53 = vmul.f32 %v1992_v50, %v742_v43  ;;  %v769_v55 = vmul.f32 %v1996_v51, %v742_v43  ;;  %v768_v49 = vmul.f32 %v2000_v52, %v742_v43 }
 0x5f8   :  { %1702 = vmatpush3.msra.mxu1 %v1992_v50  ;;  %v1113_v50 = vld [vmem:[#allocation4 + $0x48] sm:$0xff] }
 0x5f9   :  { %1703 = vmatprep.subr.mxu1 %v1867_v0 }
 0x5fa   :  { %778 = vrot.lane.b32.xlu1 %v765_v12, %s1869_s0  ;;  %1704 = vmatpush3.msra.mxu1 %v1996_v51  ;;  %v1112_v51 = vld [vmem:[#allocation4 + $0x20] sm:$0xff] }
 0x5fb   :  { %1705 = vmatprep.subr.mxu1 %v1867_v0 }
 0x5fc   :  { %1706 = vmatpush3.msra.mxu1 %v2000_v52  ;;  %v1268_v52 = vld [vmem:[#allocation2 + $0x298] sm:$0xff] }
 0x5fd   :  { %1710 = vmatprep.subr.mxu1 %v1867_v0 }
 0x5fe   :  { %776 = vrot.lane.b32.xlu1 %v764_v14, %s1869_s0 }
 0x668   :  { %v783_v15 = vpop.permute.xlu1 %782  ;;  %v781_v16 = vpop.permute.xlu0 %780 }
 0x669   :  { %1655 = vmatpush3.xpose.msk.msra.mxu0 %vm66_vm1, %v783_v15 }
 0x66a   :  { %1656 = vmatprep.subr.mxu0 %v1867_v0 }
 0x66c   :  { %v779_v17 = vpop.permute.xlu1 %778 }
 0x66d   :  { %1657 = vmatpush3.xpose.msk.msra.mxu0 %vm66_vm1, %v781_v16 }
 0x66e   :  { %1658 = vmatprep.subr.mxu0 %v1867_v0 }
 0x670   :  { %v777_v18 = vpop.permute.xlu1 %776 }
 0x671   :  { %1659 = vmatpush3.xpose.msk.msra.mxu0 %vm66_vm1, %v779_v17 }
 0x672   :  { %1660 = vmatprep.subr.mxu0 %v1867_v0 }
 0x675   :  { %1661 = vmatpush3.xpose.msk.msra.mxu0 %vm66_vm1, %v777_v18 }
 0x676   :  { %1684 = vmatprep.subr.mxu0 %v1867_v0 }
 0x678   :  { %1663 = vmatmul.mubr.msk.f32.vlgmr.msra.gmra.mxu0 %vm66_vm1, %v2015_v8 }
 0x679   :  { %1696 = vmatprep.mubr.msk.f32.mxu0 %vm1868_vm0, %v1867_v0  ;;  %1685 = vmatpush3.msra.mxu0 %v965_v29 }
 0x67a   :  { %1686 = vmatprep.subr.mxu0 %v1867_v0 }
 0x67b   :  { %1687 = vmatpush3.msra.mxu0 %v964_v30 }
 0x67c   :  { %1688 = vmatprep.subr.mxu0 %v1867_v0 }
 0x67d   :  { %1689 = vmatpush3.msra.mxu0 %v963_v31 }
 0x67e   :  { %1690 = vmatprep.subr.mxu0 %v1867_v0 }
 0x67f   :  { %1691 = vmatpush3.msra.mxu0 %v962_v32 }
 0x680   :  { %1692 = vmatprep.subr.mxu0 %v1867_v0 }
 0x681   :  { %1693 = vmatpush3.msra.mxu0 %v961_v33 }
 0x682   :  { %1694 = vmatprep.subr.mxu0 %v1867_v0 }
 0x683   :  { %1695 = vmatpush3.msra.mxu0 %v960_v34 }
 0x684   :  { %1725 = vmatprep.subr.mxu0 %v1867_v0 }
 0x6b4   :  { %v942_v20 = vpop.f32.mrf.mxu1 }
 0x6b5   :  { %v950_v21 = vsel %vm949_vm3, %v942_v20, -inf }
 0x6b6   :  { %v1683_v22 = vpop.f32.mrf.mxu1  ;;  %951 = vmax.xlane.f32.xlu0 %v950_v21  ;;  %v1346_v21 = vld [vmem:[#allocation2 + $0x90] sm:$0xff] }
 0x6b7   :  { %v1345_v22 = vld [vmem:[#allocation2 + $0x38] sm:$0xff] }
 0x738   :  { %v861_v23 = vpop.f32.mrf.mxu0 }
 0x739   :  { %v865_v25 = vmul.f32 0.125, %v861_v23  ;;  %v1269_v23 = vld [vmem:[#allocation6 + $0x30] sm:$0xff] }
 0x73a   :  { %v1664_v26 = vpop.f32.mrf.mxu0 }
 0x73b   :  { %v867_v27 = vadd.f32 %v866_v24, %v865_v25 }
 0x73d   :  { %v946_v28 = vsel %vm399_vm2, %v867_v27, -inf }
 0x73e   :  { %947 = vmax.xlane.f32.xlu1 %v946_v28  ;;  %v1353_v28 = vld [vmem:[#allocation6 + $0x38] sm:$0xff] }
 0x73f   :  { %v952_v35 = vpop.xlane.xlu0 %951 }
 0x7c7   :  { %v948_v36 = vpop.xlane.xlu1 %947 }
 0x7c8   :  { %v953_v37 = vmax.f32 %v948_v36, %v952_v35 }
 0x7ca   :  { %v954_v38 = vsub.f32 %v867_v27, %v953_v37  ;;  %v957_v39 = vsub.f32 %v942_v20, %v953_v37  ;;  %v1347_v20 = vld [vmem:[#allocation2 + $0xe8] sm:$0xff] }
 0x7cc   :  { %v955_v40 = vmul.f32 1.442695, %v954_v38  ;;  %v958_v41 = vmul.f32 1.442695, %v957_v39 }
 0x7ce   :  { %1790 = vpow2.f32 %v955_v40 }
 0x7cf   :  { %1792 = vpow2.f32 %v958_v41 }
 0x7db   :  { %v1791_v45 = vpop.eup %1790 }
 0x7dc   :  { %v1793_v46 = vpop.eup %1792  ;;  %1708 = vmatmul.mubr.msk.f32.vlgmr.msra.gmra.mxu1 %vm399_vm2, %v1791_v45 }
 0x7dd   :  { %1697 = vmatmul.mubr.msk.f32.vlgmr.msra.gmra.mxu0 %vm949_vm3, %v1793_v46  ;;  %1711 = vmatpush3.msra.mxu1 %v1117_v44 }
 0x7de   :  { %1726 = vmatpush3.msra.mxu0 %v771_v47  ;;  %1712 = vmatprep.subr.mxu1 %v1867_v0 }
 0x7df   :  { %1727 = vmatprep.subr.mxu0 %v1867_v0  ;;  %1713 = vmatpush3.msra.mxu1 %v1116_v48 }
 0x7e0   :  { %1728 = vmatpush3.msra.mxu0 %v770_v53  ;;  %1714 = vmatprep.subr.mxu1 %v1867_v0 }
 0x7e1   :  { %1729 = vmatprep.subr.mxu0 %v1867_v0  ;;  %1715 = vmatpush3.msra.mxu1 %v1115_v54 }
 0x7e2   :  { %1730 = vmatpush3.msra.mxu0 %v769_v55  ;;  %1716 = vmatprep.subr.mxu1 %v1867_v0 }
 0x7e3   :  { %1731 = vmatprep.subr.mxu0 %v1867_v0  ;;  %1717 = vmatpush3.msra.mxu1 %v1114_v56 }
 0x7e4   :  { %1732 = vmatpush3.msra.mxu0 %v768_v49  ;;  %1733 = vmatprep.mubr.msk.f32.mxu0 %vm1868_vm0, %v1867_v0 }
 0x7e5   :  { %1718 = vmatprep.subr.mxu1 %v1867_v0  ;;  %1734 = vmatmul.mubr.msk.f32.vlgmr.msra.gmra.mxu0 %vm399_vm2, %v1791_v45 }
 0x7e6   :  { %1719 = vmatpush3.msra.mxu1 %v1113_v50  ;;  %1722 = vmatprep.mubr.msk.f32.mxu1 %vm1868_vm0, %v1867_v0 }
 0x7e7   :  { %1720 = vmatprep.subr.mxu1 %v1867_v0  ;;  %1736 = vmatprep.subr.mxu0 %v1867_v0 }
 0x7e8   :  { %1721 = vmatpush3.msra.mxu1 %v1112_v51  ;;  %1752 = vmatprep.mubr.msk.f32.mxu0 %vm1868_vm0, %v1867_v0 }
 0x7e9   :  { %1723 = vmatmul.mubr.msk.f32.vlgmr.msra.gmra.mxu1 %vm949_vm3, %v1793_v46  ;;  %1755 = vmatprep.subr.mxu1 %v1867_v0 }
 0x7ea   :  { %1771 = vmatprep.mubr.msk.f32.mxu1 %vm1868_vm0, %v1867_v0  ;;  %1737 = vmatpush3.msra.mxu0 %v1268_v52 }
 0x7eb   :  { %1738 = vmatprep.subr.mxu0 %v1867_v0  ;;  %1756 = vmatpush3.msra.mxu1 %v1352_v1 }
 0x7ec   :  { %1739 = vmatpush3.msra.mxu0 %v1267_v57  ;;  %1757 = vmatprep.subr.mxu1 %v1867_v0 }
 0x7ed   :  { %1740 = vmatprep.subr.mxu0 %v1867_v0  ;;  %1758 = vmatpush3.msra.mxu1 %v1351_v2 }
 0x7ee   :  { %1741 = vmatpush3.msra.mxu0 %v1266_v58  ;;  %1759 = vmatprep.subr.mxu1 %v1867_v0 }
 0x7ef   :  { %1742 = vmatprep.subr.mxu0 %v1867_v0  ;;  %1760 = vmatpush3.msra.mxu1 %v1350_v3 }
 0x7f0   :  { %1743 = vmatpush3.msra.mxu0 %v1265_v59  ;;  %1761 = vmatprep.subr.mxu1 %v1867_v0 }
 0x7f1   :  { %1744 = vmatprep.subr.mxu0 %v1867_v0  ;;  %1762 = vmatpush3.msra.mxu1 %v1349_v4 }
 0x7f2   :  { %1745 = vmatpush3.msra.mxu0 %v1264_v60  ;;  %1763 = vmatprep.subr.mxu1 %v1867_v0 }
 0x7f3   :  { %1746 = vmatprep.subr.mxu0 %v1867_v0  ;;  %1764 = vmatpush3.msra.mxu1 %v1348_v19 }
 0x7f4   :  { %1747 = vmatpush3.msra.mxu0 %v1263_v61  ;;  %1765 = vmatprep.subr.mxu1 %v1867_v0 }
 0x7f5   :  { %1748 = vmatprep.subr.mxu0 %v1867_v0  ;;  %1766 = vmatpush3.msra.mxu1 %v1347_v20 }
 0x7f6   :  { %1749 = vmatpush3.msra.mxu0 %v1262_v62  ;;  %1767 = vmatprep.subr.mxu1 %v1867_v0 }
 0x7f7   :  { %1750 = vmatprep.subr.mxu0 %v1867_v0  ;;  %1768 = vmatpush3.msra.mxu1 %v1346_v21 }
 0x7f8   :  { %1751 = vmatpush3.msra.mxu0 %v1261_v63  ;;  %1769 = vmatprep.subr.mxu1 %v1867_v0 }
 0x7f9   :  { %1770 = vmatpush3.msra.mxu1 %v1345_v22 }
 0x89c   :  { %v1108_v5 = vpop.f32.mrf.mxu1 }
 0x89d   :  { %v1035_v6 = vpop.f32.mrf.mxu0 }
 0x89e   :  { %v1109_v7 = vadd.f32 %v1108_v5, %v1035_v6  ;;  %v1709_v9 = vpop.f32.mrf.mxu1 }
 0x89f   :  { %v1698_v10 = vpop.f32.mrf.mxu0 }
 0x8a0   :  { %1794 = vrcp.f32 %v1109_v7 }
 0x8a5   :  { %v1254_v11 = vpop.f32.mrf.mxu0 }
 0x8a7   :  { %v1735_v12 = vpop.f32.mrf.mxu0 }
 0x8a9   :  { %v1184_v13 = vpop.f32.mrf.mxu1 }
 0x8aa   :  { %v1255_v15 = vadd.f32 %v1254_v11, %v1184_v13 }
 0x8ab   :  { %v1724_v14 = vpop.f32.mrf.mxu1 }
 0x8ad   :  { %v1795_v16 = vpop.eup %1794 }
 0x8ae   :  { %v1259_v17 = vmul.f32 %v1795_v16, %v1255_v15 }
 0x8b0   :  { %v1260_v18 = vadd.f32 %v1259_v17, %v2015_v8 }
 0x8b2   :  { %1753 = vmatmul.mubr.msk.f32.vlgmr.msra.gmra.mxu0 %vm66_vm1, %v1260_v18 }
 0x972   :  { %v1339_v24 = vpop.f32.mrf.mxu0 }
 0x973   :  { %v1340_v25 = vadd.f32 %v1339_v24, %v1269_v23 }
 0x974   :  { %v1754_v8 = vpop.f32.mrf.mxu0 }
 0x975   :  { %v1343_v26 = vmax.f32 %v1340_v25, 0.0 }
 0x977   :  { %v1344_v27 = vadd.f32 %v1343_v26, %v1260_v18 }
 0x979   :  { %1772 = vmatmul.mubr.msk.f32.vlgmr.msra.gmra.mxu1 %vm66_vm1, %v1344_v27 }
 0xa39   :  { %v1423_v29 = vpop.f32.mrf.mxu1 }
 0xa3a   :  { %v1424_v30 = vadd.f32 %v1423_v29, %v1353_v28 }
 0xa3b   :  { %v1773_v31 = vpop.f32.mrf.mxu1 }
 0xa3c   :  { %1427 = vst [vmem:[%s2107_s4] sm:$0xff] %v1424_v30 }
 0xa3d   :  { %1432 = vsyncpa [#allocation3], 1 }
 0xa3e   :  { %1433 = vsyncpa [#allocation5], 1 }

</bundles_post_ra>
